<compile_context>
chip_gen: v7x
topology: tpu7x:2x2x1
jax: 0.10.0
libtpu: 0.0.40
codegen_flags: <defaults>
</compile_context>

<pallas_src>
import jax
import jax.numpy as jnp
from jax.experimental import pallas as pl
from jax.experimental.pallas import tpu as pltpu


def _round_up(x, m):
    return ((x + m - 1) // m) * m


def _cdiv(a, b):
    return -(-a // b)


def _fused_encoder_kernel(alpha_ref, x_ref, a_ref, w0_ref, b0_ref,
                          w1_ref, b1_ref, o_ref):
    k = pl.program_id(0)

    @pl.when(k == 0)
    def _init():
        o_ref[...] = jnp.zeros_like(o_ref)

    alpha = alpha_ref[0, 0]
    a_r = a_ref[...]                                   # (tile_k, Np) bf16, Â rows

    # ---- layer 0 on this row tile: H0[rows] = PReLU(Â[rows,:] @ X @ W0 + b0)
    agg = jnp.dot(a_r, x_ref[...],
                  preferred_element_type=jnp.float32)               # (tk, fin)
    h0 = jnp.dot(agg.astype(w0_ref.dtype), w0_ref[...],
                 preferred_element_type=jnp.float32) + b0_ref[...]  # (tk, hid)
    h0 = jnp.where(h0 >= 0.0, h0, alpha * h0)

    # ---- layer 1, transform before aggregation: G = H0[rows] @ W1  (tk, out)
    g = jnp.dot(h0.astype(w1_ref.dtype), w1_ref[...],
                preferred_element_type=jnp.float32)

    # ---- scatter/accumulate into the lane-dense resident output:
    #      H1^T += G^T @ Â[rows, :]   (contract tile_k; only tiny G gets
    #      re-oriented, never the (tile_k, Np) Â tile).
    o_ref[...] += jax.lax.dot_general(
        g.astype(a_r.dtype), a_r,
        dimension_numbers=(((0,), (0,)), ((), ())),
        preferred_element_type=jnp.float32)

    @pl.when(k == pl.num_programs(0) - 1)
    def _finish():
        h1 = o_ref[...] + b1_ref[...]
        o_ref[...] = jnp.where(h1 >= 0.0, h1, alpha * h1)


def build_normalized_adjacency(edge_index, num_nodes):
    """Dense Â = D^{-1/2}(A + I)D^{-1/2} from a [2, E] edge_index (plain-JAX glue).

    Note: repeated edges are dedup'd (unweighted A); matches PyG for coalesced
    edge_index.
    """
    src, dst = edge_index[0], edge_index[1]
    a = jnp.zeros((num_nodes, num_nodes), jnp.float32)
    a = a.at[dst, src].set(1.0)                 # message flows source -> target
    diag = jnp.arange(num_nodes)
    a = a.at[diag, diag].set(1.0)               # add_remaining_self_loops
    deg = a.sum(axis=1)
    dinv = jnp.where(deg > 0.0, jax.lax.rsqrt(deg), 0.0)
    return a * dinv[:, None] * dinv[None, :]


def _derive_tiling(n, fin_p, hid_p, out_p, target_tile=512):
    """Pick (tile_k, num_tiles, padded N, vmem_limit) from the device VMEM budget."""
    np0 = max(_round_up(n, 128), 128)
    try:
        vmem_cap = int(pltpu.get_tpu_info().vmem_capacity_bytes)
    except Exception:
        vmem_cap = 64 << 20                       # conservative (v7x per-TC) fallback
    budget = int(0.70 * vmem_cap)

    def vmem_need(tk, npad):
        return (
            2 * tk * npad * 2                     # Â row tile, bf16, double-buffered
            + 2 * npad * fin_p * 2                # X resident (bf16)
            + 2 * out_p * npad * 4                # resident f32 output/accumulator
            + 2 * (fin_p * hid_p + hid_p * out_p) * 2   # weights
            + 2 * (hid_p + out_p) * 4             # biases
            + tk * (fin_p + hid_p + out_p) * 4    # per-step temporaries
            + (2 << 20))                          # headroom

    tile = min(_round_up(target_tile, 128), np0)
    while True:
        nt = _cdiv(np0, tile)
        tk = _round_up(_cdiv(np0, nt), 128)
        npad = nt * tk
        need = vmem_need(tk, npad)
        if need <= budget or tile <= 128:
            break
        tile -= 128

    vmem_limit = int(min(max(need, 32 << 20), int(0.85 * vmem_cap)))
    return tk, nt, npad, vmem_limit


def encoder_forward(x, edge_index, params, *, tile_k=512):
    """Encoder.forward (skip=False, k=2): fused GCNConv+PReLU x2 in one kernel."""
    n, f_in = x.shape
    w0, b0 = params["layers"][0]
    w1, b1 = params["layers"][1]
    hidden = w0.shape[1]
    f_out = w1.shape[1]

    fin_p = _round_up(f_in, 8)
    hid_p = _round_up(hidden, 8)
    out_p = _round_up(f_out, 8)

    tk, num_tiles, np_, vmem_limit = _derive_tiling(
        n, fin_p, hid_p, out_p, target_tile=tile_k)

    a_norm = build_normalized_adjacency(edge_index, n)
    a_p = jnp.zeros((np_, np_), jnp.bfloat16).at[:n, :n].set(
        a_norm.astype(jnp.bfloat16))
    x_p = jnp.zeros((np_, fin_p), jnp.bfloat16).at[:n, :f_in].set(
        x.astype(jnp.bfloat16))
    w0_p = jnp.zeros((fin_p, hid_p), jnp.bfloat16).at[:f_in, :hidden].set(
        w0.astype(jnp.bfloat16))
    w1_p = jnp.zeros((hid_p, out_p), jnp.bfloat16).at[:hidden, :f_out].set(
        w1.astype(jnp.bfloat16))
    b0_r = jnp.zeros((1, hid_p), jnp.float32).at[0, :hidden].set(
        b0.astype(jnp.float32))
    b1_c = jnp.zeros((out_p, 1), jnp.float32).at[:f_out, 0].set(
        b1.astype(jnp.float32))
    alpha2 = jnp.asarray(params["alpha"], jnp.float32).reshape(1, 1)

    grid_spec = pltpu.PrefetchScalarGridSpec(
        num_scalar_prefetch=0,
        grid=(num_tiles,),
        in_specs=[
            pl.BlockSpec((1, 1), lambda k: (0, 0),
                         memory_space=pltpu.MemorySpace.SMEM),    # PReLU alpha
            pl.BlockSpec((np_, fin_p), lambda k: (0, 0)),         # X (resident)
            pl.BlockSpec((tk, np_), lambda k: (k, 0)),            # Â row tile
            pl.BlockSpec((fin_p, hid_p), lambda k: (0, 0)),       # W0
            pl.BlockSpec((1, hid_p), lambda k: (0, 0)),           # b0
            pl.BlockSpec((hid_p, out_p), lambda k: (0, 0)),       # W1
            pl.BlockSpec((out_p, 1), lambda k: (0, 0)),           # b1
        ],
        out_specs=pl.BlockSpec((out_p, np_), lambda k: (0, 0)),   # H1^T (resident)
    )

    h1_t = pl.pallas_call(
        _fused_encoder_kernel,
        out_shape=jax.ShapeDtypeStruct((out_p, np_), jnp.float32),
        grid_spec=grid_spec,
        compiler_params=pltpu.CompilerParams(
            dimension_semantics=("arbitrary",),    # layer-1 reduction axis
            vmem_limit_bytes=vmem_limit),
    )(alpha2, x_p, a_p, w0_p, b0_r, w1_p, b1_c)

    # Un-pad and transpose back to the reference [N, out_channels] layout.
    return h1_t[:f_out, :n].T


def _glorot(key, fan_in, fan_out):
    limit = (6.0 / (fan_in + fan_out)) ** 0.5
    return jax.random.uniform(key, (fan_in, fan_out), jnp.float32, -limit, limit)


if __name__ == "__main__":
    key = jax.random.PRNGKey(0)
    N = 16                 # number of graph nodes
    in_channels = 8
    out_channels = 16
    hidden = 2 * out_channels   # Encoder k=2: in -> 2*out -> out

    k_x, k_w0, k_w1 = jax.random.split(key, 3)
    x = jax.random.normal(k_x, (N, in_channels), jnp.float32)

    # Deterministic ring graph, both directions (no self loops).
    src = jnp.arange(N, dtype=jnp.int32)
    dst = (src + 1) % N
    edge_index = jnp.stack(
        [jnp.concatenate([src, dst]), jnp.concatenate([dst, src])], axis=0
    )

    params = {
        "layers": [
            (_glorot(k_w0, in_channels, hidden), jnp.zeros((hidden,), jnp.float32)),
            (_glorot(k_w1, hidden, out_channels), jnp.zeros((out_channels,), jnp.float32)),
        ],
        "alpha": 0.25,  # nn.PReLU() default init (shared across layers, as in forward())
    }

    out = encoder_forward(x, edge_index, params)
    jax.block_until_ready(out)
    assert out.shape == (N, out_channels)
    assert out.dtype == jnp.float32
    assert bool(jnp.all(jnp.isfinite(out)))
    print("KERNEL_OK")
</pallas_src>

<mosaic_0001>
module attributes {stable_mosaic.version = 11 : i64} {
  func.func @_fused_encoder_kernel(%arg0: i32, %arg1: memref<1x1xf32, #tpu.memory_space<smem>>, %arg2: memref<128x8xbf16, #tpu.memory_space<vmem>>, %arg3: memref<128x128xbf16, #tpu.memory_space<vmem>>, %arg4: memref<8x32xbf16, #tpu.memory_space<vmem>>, %arg5: memref<1x32xf32, #tpu.memory_space<vmem>>, %arg6: memref<32x16xbf16, #tpu.memory_space<vmem>>, %arg7: memref<16x1xf32, #tpu.memory_space<vmem>>, %arg8: memref<16x128xf32, #tpu.memory_space<vmem>>) attributes {dimension_semantics = [#tpu.dimension_semantics<arbitrary>], iteration_bounds = array<i64: 1>, scalar_prefetch = 0 : i64, scratch_operands = 0 : i64, tpu.core_type = #tpu.core_type<tc>, window_params = [{transform_indices = @transform_0, window_bounds = array<i64: 1, 1>}, {pipeline_mode = #tpu.pipeline_mode<synchronous>, transform_indices = @transform_1, window_bounds = array<i64: 128, 8>}, {transform_indices = @transform_2, window_bounds = array<i64: 128, 128>}, {pipeline_mode = #tpu.pipeline_mode<synchronous>, transform_indices = @transform_3, window_bounds = array<i64: 8, 32>}, {pipeline_mode = #tpu.pipeline_mode<synchronous>, transform_indices = @transform_4, window_bounds = array<i64: 1, 32>}, {pipeline_mode = #tpu.pipeline_mode<synchronous>, transform_indices = @transform_5, window_bounds = array<i64: 32, 16>}, {pipeline_mode = #tpu.pipeline_mode<synchronous>, transform_indices = @transform_6, window_bounds = array<i64: 16, 1>}, {pipeline_mode = #tpu.pipeline_mode<synchronous>, transform_indices = @transform_7, window_bounds = array<i64: 16, 128>}]} {
    %c0_i32 = arith.constant 0 : i32
    %0 = arith.cmpi eq, %arg0, %c0_i32 : i32
    %1 = arith.extui %0 : i1 to i32
    %c0_i32_0 = arith.constant 0 : i32
    %2 = arith.cmpi ne, %1, %c0_i32_0 : i32
    scf.if %2 {
      %cst_22 = arith.constant 0.000000e+00 : f32
      %29 = vector.broadcast %cst_22 : f32 to vector<16x128xf32>
      %c0_23 = arith.constant 0 : index
      %c0_24 = arith.constant 0 : index
      %30 = vector.load %arg8[%c0_23, %c0_24] : memref<16x128xf32, #tpu.memory_space<vmem>>, vector<16x128xf32>
      tpu.vector_store %arg8[%c0_23, %c0_24], %29 {strides = array<i32>} : memref<16x128xf32, #tpu.memory_space<vmem>>, vector<16x128xf32>,
    } else {
    }
    %c0 = arith.constant 0 : index
    %c0_1 = arith.constant 0 : index
    %3 = memref.load %arg1[%c0, %c0_1] : memref<1x1xf32, #tpu.memory_space<smem>>
    %c0_2 = arith.constant 0 : index
    %c0_3 = arith.constant 0 : index
    %4 = vector.load %arg3[%c0_2, %c0_3] : memref<128x128xbf16, #tpu.memory_space<vmem>>, vector<128x128xbf16>
    %c0_4 = arith.constant 0 : index
    %c0_5 = arith.constant 0 : index
    %5 = vector.load %arg2[%c0_4, %c0_5] : memref<128x8xbf16, #tpu.memory_space<vmem>>, vector<128x8xbf16>
    %cst = arith.constant dense<0.000000e+00> : vector<128x8xf32>
    %6 = tpu.matmul %4, %5, %cst {dimension_numbers = #tpu.dot_dimension_numbers<[1], [0], [0], [1], [0, 0, 1, 1], [], []>} : vector<128x128xbf16>, vector<128x8xbf16>, vector<128x8xf32> -> vector<128x8xf32>
    %7 = arith.truncf %6 : vector<128x8xf32> to vector<128x8xbf16>
    %c0_6 = arith.constant 0 : index
    %c0_7 = arith.constant 0 : index
    %8 = vector.load %arg4[%c0_6, %c0_7] : memref<8x32xbf16, #tpu.memory_space<vmem>>, vector<8x32xbf16>
    %cst_8 = arith.constant dense<0.000000e+00> : vector<128x32xf32>
    %9 = tpu.matmul %7, %8, %cst_8 {dimension_numbers = #tpu.dot_dimension_numbers<[1], [0], [0], [1], [0, 0, 1, 1], [], []>} : vector<128x8xbf16>, vector<8x32xbf16>, vector<128x32xf32> -> vector<128x32xf32>
    %c0_9 = arith.constant 0 : index
    %c0_10 = arith.constant 0 : index
    %10 = vector.load %arg5[%c0_9, %c0_10] : memref<1x32xf32, #tpu.memory_space<vmem>>, vector<1x32xf32>
    %11 = vector.broadcast %10 : vector<1x32xf32> to vector<128x32xf32>
    %12 = arith.addf %9, %11 : vector<128x32xf32>
    %cst_11 = arith.constant 0.000000e+00 : f32
    %13 = vector.broadcast %cst_11 : f32 to vector<128x32xf32>
    %14 = arith.cmpf oge, %12, %13 : vector<128x32xf32>
    %15 = vector.broadcast %3 : f32 to vector<128x32xf32>
    %16 = arith.mulf %15, %12 : vector<128x32xf32>
    %17 = arith.select %14, %12, %16 : vector<128x32xi1>, vector<128x32xf32>
    %18 = arith.truncf %17 : vector<128x32xf32> to vector<128x32xbf16>
    %c0_12 = arith.constant 0 : index
    %c0_13 = arith.constant 0 : index
    %19 = vector.load %arg6[%c0_12, %c0_13] : memref<32x16xbf16, #tpu.memory_space<vmem>>, vector<32x16xbf16>
    %cst_14 = arith.constant dense<0.000000e+00> : vector<128x16xf32>
    %20 = tpu.matmul %18, %19, %cst_14 {dimension_numbers = #tpu.dot_dimension_numbers<[1], [0], [0], [1], [0, 0, 1, 1], [], []>} : vector<128x32xbf16>, vector<32x16xbf16>, vector<128x16xf32> -> vector<128x16xf32>
    %c0_15 = arith.constant 0 : index
    %c0_16 = arith.constant 0 : index
    %21 = vector.load %arg8[%c0_15, %c0_16] : memref<16x128xf32, #tpu.memory_space<vmem>>, vector<16x128xf32>
    %22 = arith.truncf %20 : vector<128x16xf32> to vector<128x16xbf16>
    %cst_17 = arith.constant dense<0.000000e+00> : vector<16x128xf32>
    %23 = tpu.matmul %22, %4, %cst_17 {dimension_numbers = #tpu.dot_dimension_numbers<[0], [0], [1], [1], [0, 1, 1, 1], [], []>} : vector<128x16xbf16>, vector<128x128xbf16>, vector<16x128xf32> -> vector<16x128xf32>
    %24 = arith.addf %21, %23 : vector<16x128xf32>
    %c0_18 = arith.constant 0 : index
    %c0_19 = arith.constant 0 : index
    %25 = vector.load %arg8[%c0_18, %c0_19] : memref<16x128xf32, #tpu.memory_space<vmem>>, vector<16x128xf32>
    tpu.vector_store %arg8[%c0_18, %c0_19], %24 {strides = array<i32>} : memref<16x128xf32, #tpu.memory_space<vmem>>, vector<16x128xf32>,
    %c0_i32_20 = arith.constant 0 : i32
    %26 = arith.cmpi eq, %arg0, %c0_i32_20 : i32
    %27 = arith.extui %26 : i1 to i32
    %c0_i32_21 = arith.constant 0 : i32
    %28 = arith.cmpi ne, %27, %c0_i32_21 : i32
    scf.if %28 {
      %c0_22 = arith.constant 0 : index
      %c0_23 = arith.constant 0 : index
      %29 = vector.load %arg8[%c0_22, %c0_23] : memref<16x128xf32, #tpu.memory_space<vmem>>, vector<16x128xf32>
      %c0_24 = arith.constant 0 : index
      %c0_25 = arith.constant 0 : index
      %30 = vector.load %arg7[%c0_24, %c0_25] : memref<16x1xf32, #tpu.memory_space<vmem>>, vector<16x1xf32>
      %31 = vector.broadcast %30 : vector<16x1xf32> to vector<16x128xf32>
      %32 = arith.addf %29, %31 : vector<16x128xf32>
      %cst_26 = arith.constant 0.000000e+00 : f32
      %33 = vector.broadcast %cst_26 : f32 to vector<16x128xf32>
      %34 = arith.cmpf oge, %32, %33 : vector<16x128xf32>
      %35 = vector.broadcast %3 : f32 to vector<16x128xf32>
      %36 = arith.mulf %35, %32 : vector<16x128xf32>
      %37 = arith.select %34, %32, %36 : vector<16x128xi1>, vector<16x128xf32>
      %c0_27 = arith.constant 0 : index
      %c0_28 = arith.constant 0 : index
      %38 = vector.load %arg8[%c0_27, %c0_28] : memref<16x128xf32, #tpu.memory_space<vmem>>, vector<16x128xf32>
      tpu.vector_store %arg8[%c0_27, %c0_28], %37 {strides = array<i32>} : memref<16x128xf32, #tpu.memory_space<vmem>>, vector<16x128xf32>,
    } else {
    }
    return
  }
  func.func @transform_0(%arg0: i32) -> (i32, i32) {
    %c0_i32 = arith.constant 0 : i32
    %c0_i32_0 = arith.constant 0 : i32
    %c0_i32_1 = arith.constant 0 : i32
    return %c0_i32, %c0_i32_0 : i32, i32
  }
  func.func @transform_1(%arg0: i32) -> (i32, i32) {
    %c0_i32 = arith.constant 0 : i32
    %c0_i32_0 = arith.constant 0 : i32
    %c0_i32_1 = arith.constant 0 : i32
    return %c0_i32, %c0_i32_0 : i32, i32
  }
  func.func @transform_2(%arg0: i32) -> (i32, i32) {
    %c0_i32 = arith.constant 0 : i32
    %c0_i32_0 = arith.constant 0 : i32
    return %arg0, %c0_i32 : i32, i32
  }
  func.func @transform_3(%arg0: i32) -> (i32, i32) {
    %c0_i32 = arith.constant 0 : i32
    %c0_i32_0 = arith.constant 0 : i32
    %c0_i32_1 = arith.constant 0 : i32
    return %c0_i32, %c0_i32_0 : i32, i32
  }
  func.func @transform_4(%arg0: i32) -> (i32, i32) {
    %c0_i32 = arith.constant 0 : i32
    %c0_i32_0 = arith.constant 0 : i32
    %c0_i32_1 = arith.constant 0 : i32
    return %c0_i32, %c0_i32_0 : i32, i32
  }
  func.func @transform_5(%arg0: i32) -> (i32, i32) {
    %c0_i32 = arith.constant 0 : i32
    %c0_i32_0 = arith.constant 0 : i32
    %c0_i32_1 = arith.constant 0 : i32
    return %c0_i32, %c0_i32_0 : i32, i32
  }
  func.func @transform_6(%arg0: i32) -> (i32, i32) {
    %c0_i32 = arith.constant 0 : i32
    %c0_i32_0 = arith.constant 0 : i32
    %c0_i32_1 = arith.constant 0 : i32
    return %c0_i32, %c0_i32_0 : i32, i32
  }
  func.func @transform_7(%arg0: i32) -> (i32, i32) {
    %c0_i32 = arith.constant 0 : i32
    %c0_i32_0 = arith.constant 0 : i32
    %c0_i32_1 = arith.constant 0 : i32
    return %c0_i32, %c0_i32_0 : i32, i32
  }
}

</mosaic_0001>

<bundles_post_ra>
// kernel: tpu_custom_call.1
= control target key start
LH: loop header
LB: loop body
LE: loop exit
PB: predicated region body
PF: predicated region fallthrough
CT: control target
= control target key end

     0   :  { %s1145_s0 = inlined_call_operand.<no memory space> [shape: f32[1,1], index: 0, kind: input, shape index: {}]   ;;  %s1146_s1 = inlined_call_operand.vmem [shape: bf16[128,8], index: 1, kind: input, shape index: {}]   ;;  %s1147_s2 = inlined_call_operand.vmem [shape: bf16[128,128], index: 2, kind: input, shape index: {}]   ;;  %s1148_s3 = inlined_call_operand.vmem [shape: bf16[8,32], index: 3, kind: input, shape index: {}]   ;;  %s1149_s4 = inlined_call_operand.vmem [shape: f32[1,32], index: 4, kind: input, shape index: {}]   ;;  %s1150_s5 = inlined_call_operand.vmem [shape: bf16[32,16], index: 5, kind: input, shape index: {}]   ;;  %s1151_s6 = inlined_call_operand.vmem [shape: f32[16,1], index: 6, kind: input, shape index: {}]   ;;  %s1152_s7 = inlined_call_operand.hbm [shape: f32[16,128], index: 7, kind: output, shape index: {}]  }
   0x1   :  { %v890_v0 = vld [vmem:[%s1146_s1] sm:$0xff]   ;;  %v891_v1 = vld [vmem:[%s1146_s1 + $0x8] sm:$0xff]   ;;  %v892_v2 = vld [vmem:[%s1146_s1 + $0x10] sm:$0xff]  }
   0x2   :  { %791 = vmatprep.subr.bf16.mxu0 %v890_v0  ;;  %v893_v3 = vld [vmem:[%s1146_s1 + $0x18] sm:$0xff]   ;;  %v993_v4 = vld [vmem:[%s1147_s2] sm:$0xff]   ;;  %v895_v6 = vld [vmem:[%s1146_s1 + $0x28] sm:$0xff]  }
   0x3   :  { %792 = vmatpush3.bf16.msra.mxu0 %v890_v0  ;;  %807 = vmatprep.mubr.bf16.mxu0 %v993_v4  ;;  %v894_v5 = vld [vmem:[%s1146_s1 + $0x20] sm:$0xff]  }
   0x4   :  { %793 = vmatprep.subr.bf16.mxu0 %v891_v1 }
   0x7   :  { %794 = vmatpush3.bf16.msra.mxu0 %v891_v1 }
   0x8   :  { %795 = vmatprep.subr.bf16.mxu0 %v892_v2 }
   0xb   :  { %796 = vmatpush3.bf16.msra.mxu0 %v892_v2 }
   0xc   :  { %797 = vmatprep.subr.bf16.mxu0 %v893_v3 }
   0xf   :  { %798 = vmatpush3.bf16.msra.mxu0 %v893_v3 }
  0x10   :  { %799 = vmatprep.subr.bf16.mxu0 %v894_v5 }
  0x11   :  { %13 = vsyncpa [#allocation4], 0  ;;  %v896_v7 = vld [vmem:[%s1146_s1 + $0x30] sm:$0xff]   ;;  %v897_v8 = vld [vmem:[%s1146_s1 + $0x38] sm:$0xff]   ;;  %vm302_vm0 = vcmask 1043456   ;;  %vm277_vm1 = vcmask 64512   ;;  %v1075_v46 = vstv %s1145_s0 }
  0x12   :  { %v1011_v9 = vld [vmem:[%s1147_s2 + $0x8] sm:$0xff]   ;;  %v1016_v10 = vld [vmem:[%s1147_s2 + $0x10] sm:$0xff]   ;;  %v1023_v11 = vld [vmem:[%s1147_s2 + $0x18] sm:$0xff]   ;;  %vm476_vm6 = vcmask 261120  }
  0x13   :  { %800 = vmatpush3.bf16.msra.mxu0 %v894_v5  ;;  %v1028_v12 = vld [vmem:[%s1147_s2 + $0x20] sm:$0xff]   ;;  %v1035_v13 = vld [vmem:[%s1147_s2 + $0x28] sm:$0xff]   ;;  %v1040_v14 = vld [vmem:[%s1147_s2 + $0x30] sm:$0xff]  }
  0x14   :  { %801 = vmatprep.subr.bf16.mxu0 %v895_v6  ;;  %v1047_v15 = vld [vmem:[%s1147_s2 + $0x38] sm:$0xff]   ;;  %v269_v16 = vld [vmem:[%s1148_s3] sm:$0xf]  ;;  %v907_v25 = vld [vmem:[%s1150_s5 + $0x8] sm:$0xff]  }
  0x15   :  { %881 = vmatprep.subr.msk.bf16.mxu1 %vm302_vm0, %v269_v16  ;;  %v304_v17 = vsel %vm302_vm0, %v269_v16, 0  ;;  %v906_v18 = vld [vmem:[%s1150_s5] sm:$0xff]  }
  0x16   :  { %824 = vmatpush3.bf16.msra.mxu1 %v304_v17  ;;  %v1070_v44 = vld [vmem:[%s1149_s4] ss:$0 sm:$0xff] }
  0x17   :  { %802 = vmatpush3.bf16.msra.mxu0 %v895_v6  ;;  %841 = vmatprep.subr.bf16.mxu1 %v906_v18 }
  0x18   :  { %803 = vmatprep.subr.bf16.mxu0 %v896_v7 }
  0x1b   :  { %804 = vmatpush3.bf16.msra.mxu0 %v896_v7 }
  0x1c   :  { %805 = vmatprep.subr.bf16.mxu0 %v897_v8 }
  0x1f   :  { %806 = vmatpush3.bf16.msra.mxu0 %v897_v8 }
  0x22   :  { %808 = vmatmul.mubr.bf16.vlgmr.msra.gmra.mrb[0].mxu0 %v1011_v9 }
  0x23   :  { %811 = vmatprep.mubr.bf16.mxu0 %v1016_v10 }
  0x2a   :  { %812 = vmatmul.mubr.bf16.gmra.mrb[4].mxu0 %v1023_v11 }
  0x2b   :  { %815 = vmatprep.mubr.bf16.mxu0 %v1028_v12 }
  0x32   :  { %816 = vmatmul.mubr.bf16.gmra.mrb[8].mxu0 %v1035_v13 }
  0x33   :  { %819 = vmatprep.mubr.bf16.mxu0 %v1040_v14 }
  0x3a   :  { %820 = vmatmul.mubr.bf16.gmra.mrb[12].mxu0 %v1047_v15 }
  0xf5   :  { %v809_v19 = vpop.f32.mrb[0].mxu0 }
  0xf6   :  { %v198_v20 = vpop.f32.mrb[1].mxu0 }
  0xf7   :  { %v810_v21 = vpop.f32.mrb[2].mxu0 }
  0xf8   :  { %v262_v22 = vpack.c.bf16 %v810_v21, %v809_v19  ;;  %v201_v23 = vpop.f32.mrb[3].mxu0 }
  0xf9   :  { %v261_v24 = vpack.c.bf16 %v201_v23, %v198_v20 }
  0xfb   :  { %825 = vmatprep.mubr.msk.bf16.mxu1 %vm277_vm1, %v261_v24 }
  0xfc   :  { %826 = vmatmul.mubr.msk.bf16.vlgmr.msra.gmra.mrb[0].mxu1 %vm277_vm1, %v262_v22 }
  0xfd   :  { %v813_v26 = vpop.f32.mrb[4].mxu0  ;;  %842 = vmatpush3.bf16.msra.mxu1 %v906_v18 }
  0xfe   :  { %v214_v27 = vpop.f32.mrb[5].mxu0  ;;  %843 = vmatprep.subr.bf16.mxu1 %v907_v25 }
  0xff   :  { %v814_v28 = vpop.f32.mrb[6].mxu0 }
 0x100   :  { %v264_v29 = vpack.c.bf16 %v814_v28, %v813_v26  ;;  %v217_v30 = vpop.f32.mrb[7].mxu0 }
 0x101   :  { %v263_v31 = vpack.c.bf16 %v217_v30, %v214_v27  ;;  %844 = vmatpush3.bf16.msra.mxu1 %v907_v25 }
 0x103   :  { %829 = vmatprep.mubr.msk.bf16.mxu1 %vm277_vm1, %v263_v31 }
 0x104   :  { %830 = vmatmul.mubr.msk.bf16.gmra.mrb[4].mxu1 %vm277_vm1, %v264_v29 }
 0x105   :  { %v817_v32 = vpop.f32.mrb[8].mxu0 }
 0x106   :  { %v230_v33 = vpop.f32.mrb[9].mxu0 }
 0x107   :  { %v818_v34 = vpop.f32.mrb[10].mxu0 }
 0x108   :  { %v266_v35 = vpack.c.bf16 %v818_v34, %v817_v32  ;;  %v233_v36 = vpop.f32.mrb[11].mxu0 }
 0x109   :  { %v265_v37 = vpack.c.bf16 %v233_v36, %v230_v33 }
 0x10b   :  { %833 = vmatprep.mubr.msk.bf16.mxu1 %vm277_vm1, %v265_v37 }
 0x10c   :  { %834 = vmatmul.mubr.msk.bf16.gmra.mrb[8].mxu1 %vm277_vm1, %v266_v35 }
 0x10d   :  { %v821_v38 = vpop.f32.mrb[12].mxu0 }
 0x10e   :  { %v246_v39 = vpop.f32.mrb[13].mxu0 }
 0x10f   :  { %v822_v40 = vpop.f32.mrb[14].mxu0 }
 0x110   :  { %v268_v41 = vpack.c.bf16 %v822_v40, %v821_v38  ;;  %v249_v42 = vpop.f32.mrb[15].mxu0 }
 0x111   :  { %v267_v43 = vpack.c.bf16 %v249_v42, %v246_v39 }
 0x113   :  { %837 = vmatprep.mubr.msk.bf16.mxu1 %vm277_vm1, %v267_v43 }
 0x114   :  { %838 = vmatmul.mubr.msk.bf16.gmra.mrb[12].mxu1 %vm277_vm1, %v268_v41 }
 0x1cf   :  { %v827_v45 = vpop.f32.mrb[0].mxu1 }
 0x1d0   :  { %v349_v47 = vadd.f32 %v827_v45, %v1070_v44  ;;  %v340_v48 = vpop.f32.mrb[1].mxu1 }
 0x1d1   :  { %v341_v49 = vadd.f32 %v1070_v44, %v340_v48  ;;  %v828_v50 = vpop.f32.mrb[2].mxu1 }
 0x1d2   :  { %v422_v51 = vmul.f32 %v1075_v46, %v349_v47  ;;  %v352_v52 = vadd.f32 %v828_v50, %v1070_v44  ;;  %v343_v53 = vpop.f32.mrb[3].mxu1  ;;  %vm405_vm2 = vcmp.ge.f32.partialorder %v349_v47, 0.0 }
 0x1d3   :  { %v420_v54 = vmul.f32 %v1075_v46, %v341_v49  ;;  %v344_v55 = vadd.f32 %v1070_v44, %v343_v53  ;;  %vm403_vm3 = vcmp.ge.f32.partialorder %v341_v49, 0.0 }
 0x1d4   :  { %vm406_vm4 = vcmp.ge.f32.partialorder %v352_v52, 0.0  ;;  %v423_v56 = vmul.f32 %v1075_v46, %v352_v52  ;;  %v438_v58 = vsel %vm405_vm2, %v349_v47, %v422_v51 }
 0x1d5   :  { %vm404_vm5 = vcmp.ge.f32.partialorder %v344_v55, 0.0  ;;  %v421_v57 = vmul.f32 %v1075_v46, %v344_v55  ;;  %v436_v60 = vsel %vm403_vm3, %v341_v49, %v420_v54  ;;  %vm933_vm3 = vmmov 0  }
 0x1d6   :  { %v439_v59 = vsel %vm406_vm4, %v352_v52, %v423_v56 }
 0x1d7   :  { %v453_v61 = vpack.c.bf16 %v439_v59, %v438_v58  ;;  %v437_v62 = vsel %vm404_vm5, %v344_v55, %v421_v57  ;;  %v831_v63 = vpop.f32.mrb[4].mxu1 }
 0x1d8   :  { %v452_v0 = vpack.c.bf16 %v437_v62, %v436_v60  ;;  %v365_v1 = vadd.f32 %v831_v63, %v1070_v44  ;;  %v356_v2 = vpop.f32.mrb[5].mxu1 }
 0x1d9   :  { %v357_v3 = vadd.f32 %v1070_v44, %v356_v2  ;;  %v832_v5 = vpop.f32.mrb[6].mxu1 }
 0x1da   :  { %v426_v6 = vmul.f32 %v1075_v46, %v365_v1  ;;  %v368_v7 = vadd.f32 %v832_v5, %v1070_v44  ;;  %v359_v8 = vpop.f32.mrb[7].mxu1  ;;  %845 = vmatprep.mubr.msk.bf16.mxu1 %vm476_vm6, %v452_v0  ;;  %vm409_vm7 = vcmp.ge.f32.partialorder %v365_v1, 0.0 }
 0x1db   :  { %v424_v16 = vmul.f32 %v1075_v46, %v357_v3  ;;  %v360_v17 = vadd.f32 %v1070_v44, %v359_v8  ;;  %846 = vmatmul.mubr.msk.bf16.vlgmr.msra.gmra.mrb[16].mxu1 %vm476_vm6, %v453_v61  ;;  %vm407_vm8 = vcmp.ge.f32.partialorder %v357_v3, 0.0 }
 0x1dc   :  { %vm410_vm9 = vcmp.ge.f32.partialorder %v368_v7, 0.0  ;;  %v427_v18 = vmul.f32 %v1075_v46, %v368_v7  ;;  %v442_v20 = vsel %vm409_vm7, %v365_v1, %v426_v6 }
 0x1dd   :  { %vm408_vm10 = vcmp.ge.f32.partialorder %v360_v17, 0.0  ;;  %v425_v19 = vmul.f32 %v1075_v46, %v360_v17  ;;  %v440_v22 = vsel %vm407_vm8, %v357_v3, %v424_v16 }
 0x1de   :  { %v443_v21 = vsel %vm410_vm9, %v368_v7, %v427_v18 }
 0x1df   :  { %v455_v23 = vpack.c.bf16 %v443_v21, %v442_v20  ;;  %v441_v24 = vsel %vm408_vm10, %v360_v17, %v425_v19  ;;  %v835_v25 = vpop.f32.mrb[8].mxu1 }
 0x1e0   :  { %v454_v26 = vpack.c.bf16 %v441_v24, %v440_v22  ;;  %v381_v27 = vadd.f32 %v835_v25, %v1070_v44  ;;  %v372_v28 = vpop.f32.mrb[9].mxu1 }
 0x1e1   :  { %v373_v29 = vadd.f32 %v1070_v44, %v372_v28  ;;  %v836_v30 = vpop.f32.mrb[10].mxu1 }
 0x1e2   :  { %v430_v31 = vmul.f32 %v1075_v46, %v381_v27  ;;  %v384_v32 = vadd.f32 %v836_v30, %v1070_v44  ;;  %v375_v33 = vpop.f32.mrb[11].mxu1  ;;  %849 = vmatprep.mubr.msk.bf16.mxu1 %vm476_vm6, %v454_v26  ;;  %vm413_vm11 = vcmp.ge.f32.partialorder %v381_v27, 0.0 }
 0x1e3   :  { %v428_v34 = vmul.f32 %v1075_v46, %v373_v29  ;;  %v376_v35 = vadd.f32 %v1070_v44, %v375_v33  ;;  %850 = vmatmul.mubr.msk.bf16.gmra.mrb[20].mxu1 %vm476_vm6, %v455_v23  ;;  %vm411_vm12 = vcmp.ge.f32.partialorder %v373_v29, 0.0 }
 0x1e4   :  { %vm414_vm13 = vcmp.ge.f32.partialorder %v384_v32, 0.0  ;;  %v431_v36 = vmul.f32 %v1075_v46, %v384_v32  ;;  %v446_v38 = vsel %vm413_vm11, %v381_v27, %v430_v31 }
 0x1e5   :  { %vm412_vm14 = vcmp.ge.f32.partialorder %v376_v35, 0.0  ;;  %v429_v37 = vmul.f32 %v1075_v46, %v376_v35  ;;  %v444_v40 = vsel %vm411_vm12, %v373_v29, %v428_v34 }
 0x1e6   :  { %v447_v39 = vsel %vm414_vm13, %v384_v32, %v431_v36 }
 0x1e7   :  { %v457_v41 = vpack.c.bf16 %v447_v39, %v446_v38  ;;  %v445_v42 = vsel %vm412_vm14, %v376_v35, %v429_v37  ;;  %v839_v43 = vpop.f32.mrb[12].mxu1 }
 0x1e8   :  { %v456_v45 = vpack.c.bf16 %v445_v42, %v444_v40  ;;  %v397_v47 = vadd.f32 %v839_v43, %v1070_v44  ;;  %v388_v48 = vpop.f32.mrb[13].mxu1 }
 0x1e9   :  { %v389_v49 = vadd.f32 %v1070_v44, %v388_v48  ;;  %v840_v50 = vpop.f32.mrb[14].mxu1 }
 0x1ea   :  { %v434_v51 = vmul.f32 %v1075_v46, %v397_v47  ;;  %v400_v52 = vadd.f32 %v840_v50, %v1070_v44  ;;  %v391_v53 = vpop.f32.mrb[15].mxu1  ;;  %853 = vmatprep.mubr.msk.bf16.mxu1 %vm476_vm6, %v456_v45  ;;  %vm417_vm15 = vcmp.ge.f32.partialorder %v397_v47, 0.0 }
 0x1eb   :  { %v432_v54 = vmul.f32 %v1075_v46, %v389_v49  ;;  %v392_v55 = vadd.f32 %v1070_v44, %v391_v53  ;;  %854 = vmatmul.mubr.msk.bf16.gmra.mrb[24].mxu1 %vm476_vm6, %v457_v41  ;;  %vm415_vm0 = vcmp.ge.f32.partialorder %v389_v49, 0.0  ;;  %v932_v44 = vmov 0.0  }
 0x1ec   :  { %vm418_vm1 = vcmp.ge.f32.partialorder %v400_v52, 0.0  ;;  %v435_v56 = vmul.f32 %v1075_v46, %v400_v52  ;;  %v450_v58 = vsel %vm417_vm15, %v397_v47, %v434_v51  ;;  %861 = vmatprep.subr.bf16.mxu0 %v932_v44  ;;  %877 = vmatprep.mubr.msk.bf16.mxu0 %vm933_vm3, %v932_v44 }
 0x1ed   :  { %vm416_vm2 = vcmp.ge.f32.partialorder %v392_v55, 0.0  ;;  %v433_v57 = vmul.f32 %v1075_v46, %v392_v55  ;;  %v448_v60 = vsel %vm415_vm0, %v389_v49, %v432_v54  ;;  %862 = vmatpush3.bf16.msra.mxu0 %v993_v4  ;;  %v674_v4 = vld [vmem:[%s1151_s6] sm:$0xff] }
 0x1ee   :  { %v451_v59 = vsel %vm418_vm1, %v400_v52, %v435_v56  ;;  %863 = vmatprep.subr.bf16.mxu0 %v932_v44 }
 0x1ef   :  { %v459_v61 = vpack.c.bf16 %v451_v59, %v450_v58  ;;  %v449_v62 = vsel %vm416_vm2, %v392_v55, %v433_v57 }
 0x1f0   :  { %v458_v63 = vpack.c.bf16 %v449_v62, %v448_v60 }
 0x1f1   :  { %864 = vmatpush3.bf16.msra.mxu0 %v1011_v9  ;;  %v934_v9 = vmov 0  }
 0x1f2   :  { %857 = vmatprep.mubr.msk.bf16.mxu1 %vm476_vm6, %v458_v63  ;;  %865 = vmatprep.subr.bf16.mxu0 %v932_v44 }
 0x1f3   :  { %858 = vmatmul.mubr.msk.bf16.gmra.mrb[28].mxu1 %vm476_vm6, %v459_v61  ;;  %888 = vset.pattern.permute.xlu1 %v934_v9 }
 0x1f4   :  { %678 = vperm.xlu1 %888, %v674_v4  }
 0x1f5   :  { %866 = vmatpush3.bf16.msra.mxu0 %v1016_v10  ;;  %v675_v10 = vld [vmem:[%s1151_s6 + $0x8] sm:$0xff]  ;;  %s935_s6 = smov [#allocation3]  }
 0x1f6   :  { %867 = vmatprep.subr.bf16.mxu0 %v932_v44  ;;  %s701_s18 = sshll.u32 %s935_s6, 4  ;;  %s702_s18 = int_to_ptr.vmem [resolvable:$true] %s701_s18 }
 0x1f7   :  { %s908_s19 = scalar_lea.vmem %s702_s18, 256  ;;  %p913_p1 = scmp.lt.s32.totalorder %s702_s18, %s702_s18 }
 0x1f8   :  { %683 = vperm.xlu1 %888, %v675_v10   ;;  %p909_p0 = scmp.ne.s32.totalorder %s702_s18, %s908_s19  ;;  %p914_p2 = scmp.lt.s32.totalorder %s908_s19, %s908_s19 }
 0x1f9   :  { %868 = vmatpush3.bf16.msra.mxu0 %v1023_v11 }
 0x1fa   :  { %869 = vmatprep.subr.bf16.mxu0 %v932_v44  ;;  %p915_p3 = por %p914_p2, %p913_p1 }
 0x1fc   :  { %p916_p4 = pnand %p915_p3, %p909_p0 }
 0x1fd   :  { %870 = vmatpush3.bf16.msra.mxu0 %v1028_v12 }
 0x1fe   :  { %871 = vmatprep.subr.bf16.mxu0 %v932_v44 }
 0x201   :  { %872 = vmatpush3.bf16.msra.mxu0 %v1035_v13 }
 0x202   :  { %873 = vmatprep.subr.bf16.mxu0 %v932_v44 }
 0x205   :  { %874 = vmatpush3.bf16.msra.mxu0 %v1040_v14 }
 0x206   :  { %875 = vmatprep.subr.bf16.mxu0 %v932_v44 }
 0x209   :  { %876 = vmatpush3.bf16.msra.mxu0 %v1047_v15 }
 0x273   :  { %v679_v28 = vpop.permute.xlu1 %678 }
 0x277   :  { %v684_v34 = vpop.permute.xlu1 %683 }
 0x2ae   :  { %v847_v11 = vpop.f32.mrb[16].mxu1 }
 0x2af   :  { %v535_v12 = vpop.f32.mrb[17].mxu1 }
 0x2b0   :  { %v848_v13 = vpop.f32.mrb[18].mxu1 }
 0x2b1   :  { %v601_v14 = vpack.c.bf16 %v848_v13, %v847_v11  ;;  %v538_v0 = vpop.f32.mrb[19].mxu1 }
 0x2b2   :  { %v600_v15 = vpack.c.bf16 %v538_v0, %v535_v12 }
 0x2b4   :  { %608 = vxpose.xlu0.c.b16.start [1/8] (narrow) %v600_v15, 16 }
 0x2b6   :  { %v851_v1 = vpop.f32.mrb[20].mxu1 }
 0x2b7   :  { %v551_v2 = vpop.f32.mrb[21].mxu1 }
 0x2b8   :  { %609 = vxpose.xlu0.c.b16.cont [2/8] (narrow) %v601_v14, 16  ;;  %v852_v3 = vpop.f32.mrb[22].mxu1 }
 0x2b9   :  { %v603_v5 = vpack.c.bf16 %v852_v3, %v851_v1  ;;  %v554_v6 = vpop.f32.mrb[23].mxu1 }
 0x2ba   :  { %v602_v7 = vpack.c.bf16 %v554_v6, %v551_v2 }
 0x2bc   :  { %610 = vxpose.xlu0.c.b16.cont [3/8] (narrow) %v602_v7, 16 }
 0x2be   :  { %v855_v8 = vpop.f32.mrb[24].mxu1 }
 0x2bf   :  { %v567_v16 = vpop.f32.mrb[25].mxu1 }
 0x2c0   :  { %611 = vxpose.xlu0.c.b16.cont [4/8] (narrow) %v603_v5, 16  ;;  %v856_v17 = vpop.f32.mrb[26].mxu1 }
 0x2c1   :  { %v605_v18 = vpack.c.bf16 %v856_v17, %v855_v8  ;;  %v570_v19 = vpop.f32.mrb[27].mxu1 }
 0x2c2   :  { %v604_v20 = vpack.c.bf16 %v570_v19, %v567_v16 }
 0x2c4   :  { %612 = vxpose.xlu0.c.b16.cont [5/8] (narrow) %v604_v20, 16 }
 0x2c6   :  { %v859_v21 = vpop.f32.mrb[28].mxu1 }
 0x2c7   :  { %v583_v22 = vpop.f32.mrb[29].mxu1 }
 0x2c8   :  { %613 = vxpose.xlu0.c.b16.cont [6/8] (narrow) %v605_v18, 16  ;;  %v860_v23 = vpop.f32.mrb[30].mxu1 }
 0x2c9   :  { %v607_v24 = vpack.c.bf16 %v860_v23, %v859_v21  ;;  %v586_v25 = vpop.f32.mrb[31].mxu1 }
 0x2ca   :  { %v606_v26 = vpack.c.bf16 %v586_v25, %v583_v22 }
 0x2cc   :  { %614 = vxpose.xlu0.c.b16.cont [7/8] (narrow) %v606_v26, 16 }
 0x2d0   :  { %615 = vxpose.xlu0.c.b16.end [8/8] (narrow) %v607_v24, 16 }
 0x2d9   :  { %889 = vset.pattern.permute.xlu0 %v934_v9 }
 0x31a   :  { %v616_v27 = vpop.trf.xlu0 }
 0x31b   :  { %878 = vmatmul.mubr.bf16.vlgmr.msra.gmra.mrb[16].mxu0 %v616_v27 }
 0x3ee   :  { %v658_v29 = vpop.f32.mrb[16].mxu0 }
 0x3ef   :  { %v879_v30 = vpop.f32.mrb[17].mxu0  ;;  %v686_v33 = vadd.f32 %v679_v28, %v658_v29 }
 0x3f0   :  { %v661_v31 = vpop.f32.mrb[18].mxu0 }
 0x3f1   :  { %v880_v32 = vpop.f32.mrb[19].mxu0  ;;  %vm688_vm4 = vcmp.ge.f32.partialorder %v686_v33, 0.0  ;;  %v690_v35 = vmul.f32 %v686_v33, %v1075_v46  ;;  %v687_v36 = vadd.f32 %v684_v34, %v661_v31 }
 0x3f3   :  { %v692_v37 = vsel %vm688_vm4, %v686_v33, %v690_v35  ;;  %vm689_vm5 = vcmp.ge.f32.partialorder %v687_v36, 0.0  ;;  %v691_v38 = vmul.f32 %v687_v36, %v1075_v46 }
 0x3f4   :  { %694 = vst [vmem:[#allocation3] sm:$0xff] %v692_v37 }
 0x3f5   :  { %v693_v39 = vsel %vm689_vm5, %v687_v36, %v691_v38 }
 0x3f6   :  { %695 = vst [vmem:[#allocation3 + $0x8] sm:$0xff] %v693_v39 }
 0x3f7   :  { %919 = shalt.err (!%p916_p4)
}
 0x3f8   :  { %s920_s22 = scalar_lea.hbm %s1152_s7, 256 }
 0x3f9   :  { %p921_p5 = scmp.ne.s32.totalorder %s1152_s7, %s920_s22  ;;  %p924_p6 = scmp.lt.u32.totalorder %s920_s22, %s1152_s7 }
 0x3fb   :  { %p926_p7 = pnand %p924_p6, %p921_p5 }
 0x3fd   :  { %929 = shalt.err (!%p926_p7)
}
 0x3fe   :  { %s936_s26 = smov 128   ;;  %s937_s27 = smov 8  }
 0x3ff   :  { %707 = dma.vmem_to_hbm [thread:$0]  %s702_s18, 256, %s1152_s7, [#allocation4], %s936_s26, %s936_s26, %s937_s27  }
 0x400   :  { %930 = dma.done.wait [#allocation4], 256  }
 0x401   :  { %931 = vsyncadd [#allocation4], 4294967040 }
 0x402   :  { %711 = vsyncpa [#allocation4], 1 }

</bundles_post_ra>
